<compile_context>
chip_gen: v5e
topology: v5e:2x2
jax: 0.10.0
libtpu: 0.0.40
codegen_flags: <defaults>
</compile_context>

<pallas_src>
from functools import partial

import jax
import jax.numpy as jnp
from jax.experimental import pallas as pl
from jax.experimental.pallas import tpu as pltpu


def _round_up(x, m):
    return (x + m - 1) // m * m


# --------------------------------------------------------------------------- #
# Kernel: feature-major fused MLP
# --------------------------------------------------------------------------- #
def _mlp_kernel(x_ref, w1, b1, w2, b2, w3, b3, wh, bh, out_ref):
    """3x (Linear[BN folded] -> ReLU) -> Linear head.

    Activations are feature-major (features on sublanes, batch on lanes), so
    every matmul is W(out,in) @ h(in,tb) with standard minor/major contraction
    (no transposes), and every store is lane-dense.
    """
    h = x_ref[...]                                              # (D, tb) f32
    for w, b in ((w1, b1), (w2, b2), (w3, b3)):
        h = jnp.dot(w[...], h, preferred_element_type=jnp.float32) + b[...]
        h = jnp.maximum(h, 0.0)          # ReLU; Dropout = identity at inference
    o = jnp.dot(wh[...], h, preferred_element_type=jnp.float32) + bh[...]
    out_ref[...] = o.astype(out_ref.dtype)                      # (O_pad, tb)


# --------------------------------------------------------------------------- #
# Parameter construction (mirrors Net.__init__ / _weight_init at eval time)
# --------------------------------------------------------------------------- #
def init_params(key, input_dim, output_dim, layers=(32, 32, 32)):
    """Linear: xavier_normal_ weights, U(-1/sqrt(fan_in), +) biases.
    BatchNorm1d (eval): gamma=1, beta=0, running_mean=0, running_var=1, eps=1e-5,
    stored pre-combined as (scale, shift)."""
    dims = [input_dim] + list(layers) + [output_dim]
    params = {"w": [], "b": [], "scale": [], "shift": []}
    eps = 1e-5
    for li, (fan_in, fan_out) in enumerate(zip(dims[:-1], dims[1:])):
        key, kw, kb = jax.random.split(key, 3)
        std = (2.0 / (fan_in + fan_out)) ** 0.5            # xavier_normal_, gain=1
        w = jax.random.normal(kw, (fan_in, fan_out), jnp.float32) * std  # (in, out)
        bound = 1.0 / (fan_in ** 0.5)
        b = jax.random.uniform(kb, (1, fan_out), jnp.float32, -bound, bound)
        params["w"].append(w)
        params["b"].append(b)
        if li < len(layers):                               # hidden layers carry BN
            gamma = jnp.ones((1, fan_out), jnp.float32)
            beta = jnp.zeros((1, fan_out), jnp.float32)
            running_mean = jnp.zeros((1, fan_out), jnp.float32)
            running_var = jnp.ones((1, fan_out), jnp.float32)
            scale = gamma / jnp.sqrt(running_var + eps)
            shift = beta - running_mean * scale
            params["scale"].append(scale)
            params["shift"].append(shift)
    return params


def prepare_params(params):
    """Run ONCE per model (hoisted out of the per-call path).

    Folds eval-mode BN into each hidden Linear, transposes everything to
    feature-major (out, in), and zero-pads hidden/output dims to TPU tiles.
    The first layer's input dim is left unpadded (matches the unpadded x)."""
    n_hidden = len(params["scale"])
    wts, bs = [], []
    for li in range(n_hidden):
        w, b = params["w"][li], params["b"][li]            # (in, out), (1, out)
        s, t = params["scale"][li], params["shift"][li]
        wf = (w * s).T                                     # (out, in), BN folded
        bf = (b * s + t).T                                 # (out, 1)
        out_dim, in_dim = wf.shape
        out_p = _round_up(out_dim, 128)
        in_p = in_dim if li == 0 else _round_up(in_dim, 128)
        wts.append(jnp.pad(wf, ((0, out_p - out_dim), (0, in_p - in_dim))))
        bs.append(jnp.pad(bf, ((0, out_p - out_dim), (0, 0))))
    w_head = params["w"][n_hidden]                         # (K, O)
    b_head = params["b"][n_hidden]                         # (1, O)
    K, O = w_head.shape
    K_p = _round_up(K, 128)
    O_p = _round_up(max(O, 8), 8)                          # sublane-aligned rows
    wh = jnp.pad(w_head.T, ((0, O_p - O), (0, K_p - K)))   # (O_p, K_p)
    bh = jnp.pad(b_head.T, ((0, O_p - O), (0, 0)))         # (O_p, 1)
    return tuple(wts), tuple(bs), wh, bh


def _choose_tb(B):
    """Batch tile (lane dim).  Tiny batches: one full-extent tile.  Otherwise
    tiles are multiples of 128, as large as possible (<=2048) to amortize the
    ~0.35us grid-step overhead, with an even grid >=2 so v7x's two TensorCores
    both get (balanced) work.  VMEM per step stays far below every generation's
    limit even at tb=2048."""
    if B <= 128:
        return max(B, 1)
    n_tiles = max(2, 2 * (-(-B // 4096)))          # even, >= 2, each tile <= 2048
    return min(2048, _round_up(-(-B // n_tiles), 128))


# --------------------------------------------------------------------------- #
# Wrapper
# --------------------------------------------------------------------------- #
@partial(jax.jit, static_argnames=("out_dim",))
def net_forward(x, wts, bs, wh, bh, *, out_dim):
    B, D = x.shape
    assert len(wts) == 3, "kernel is specialized for 3 hidden layers"
    O_pad = wh.shape[0]

    tb = _choose_tb(B)
    grid = (B + tb - 1) // tb                      # partial last block is fine:
                                                   # batch columns are independent
    x_t = x.astype(jnp.float32).T                  # (D, B) feature-major; tiny

    def const_spec(a):
        return pl.BlockSpec(a.shape, lambda i: (0, 0))

    operands = [x_t]
    in_specs = [pl.BlockSpec((D, tb), lambda i: (0, i))]
    for w, b in zip(wts, bs):
        operands += [w, b]
        in_specs += [const_spec(w), const_spec(b)]
    operands += [wh, bh]
    in_specs += [const_spec(wh), const_spec(bh)]

    flops = 2 * B * sum(int(w.shape[0] * w.shape[1]) for w in list(wts) + [wh])
    bytes_accessed = 4 * (x_t.size
                          + sum(w.size + b.size for w, b in zip(wts, bs))
                          + wh.size + bh.size + O_pad * B)

    out = pl.pallas_call(
        _mlp_kernel,
        out_shape=jax.ShapeDtypeStruct((O_pad, B), jnp.float32),
        grid=(grid,),
        in_specs=in_specs,
        out_specs=pl.BlockSpec((O_pad, tb), lambda i: (0, i)),
        compiler_params=pltpu.CompilerParams(
            dimension_semantics=("parallel",)),
        cost_estimate=pl.CostEstimate(
            flops=flops, transcendentals=0, bytes_accessed=bytes_accessed),
    )(*operands)

    # (O_pad, B) lane-dense output -> (B, out_dim)
    return out[:out_dim, :].T.astype(x.dtype)


def net_forward_ref(x, params):
    """Pure-JAX reference (unpadded, unfolded) for correctness checking."""
    h = x.astype(jnp.float32)
    for li in range(len(params["scale"])):
        h = h @ params["w"][li] + params["b"][li]
        h = h * params["scale"][li] + params["shift"][li]
        h = jnp.maximum(h, 0.0)
    return (h @ params["w"][-1] + params["b"][-1]).astype(x.dtype)


# TODO(synk): only the loss='mse' head is implemented (the 'binary' variant adds a
# sigmoid); Dropout/BatchNorm are in eval mode as in inference.

if __name__ == "__main__":
    key = jax.random.PRNGKey(0)
    key, kx1, kx2 = jax.random.split(key, 3)

    input_dim, output_dim, hidden = 16, 1, (32, 32, 32)
    params = init_params(key, input_dim, output_dim, layers=hidden)
    wts, bs, wh, bh = prepare_params(params)       # hoisted: run once per model

    # Small, single-tile case (tb == B, grid = 1).
    x_small = jax.random.normal(kx1, (16, input_dim), jnp.float32)
    out_small = jax.block_until_ready(
        net_forward(x_small, wts, bs, wh, bh, out_dim=output_dim))
    ref_small = net_forward_ref(x_small, params)
    assert out_small.shape == (16, output_dim)
    assert jnp.allclose(out_small, ref_small, atol=1e-4, rtol=1e-4), \
        "small-batch mismatch vs JAX reference"

    # Multi-tile case: grid = 2 ('parallel' axis for both v7x TensorCores) with a
    # partial last block (no wrapper-side batch padding) and lane-dense output.
    x_big = jax.random.normal(kx2, (260, input_dim), jnp.float32)
    out_big = jax.block_until_ready(
        net_forward(x_big, wts, bs, wh, bh, out_dim=output_dim))
    ref_big = net_forward_ref(x_big, params)
    assert out_big.shape == (260, output_dim)
    assert jnp.allclose(out_big, ref_big, atol=1e-4, rtol=1e-4), \
        "multi-tile mismatch vs JAX reference"

    print("KERNEL_OK")
</pallas_src>

<mosaic_0001>
module attributes {stable_mosaic.version = 11 : i64} {
  func.func @_mlp_kernel(%arg0: i32, %arg1: memref<16x16xf32, #tpu.memory_space<vmem>>, %arg2: memref<128x16xf32, #tpu.memory_space<vmem>>, %arg3: memref<128x1xf32, #tpu.memory_space<vmem>>, %arg4: memref<128x128xf32, #tpu.memory_space<vmem>>, %arg5: memref<128x1xf32, #tpu.memory_space<vmem>>, %arg6: memref<128x128xf32, #tpu.memory_space<vmem>>, %arg7: memref<128x1xf32, #tpu.memory_space<vmem>>, %arg8: memref<8x128xf32, #tpu.memory_space<vmem>>, %arg9: memref<8x1xf32, #tpu.memory_space<vmem>>, %arg10: memref<8x16xf32, #tpu.memory_space<vmem>>) attributes {dimension_semantics = [#tpu.dimension_semantics<parallel>], iteration_bounds = array<i64: 1>, scalar_prefetch = 0 : i64, scratch_operands = 0 : i64, tpu.core_type = #tpu.core_type<tc>, window_params = [{transform_indices = @transform_0, window_bounds = array<i64: 16, 16>}, {pipeline_mode = #tpu.pipeline_mode<synchronous>, transform_indices = @transform_1, window_bounds = array<i64: 128, 16>}, {pipeline_mode = #tpu.pipeline_mode<synchronous>, transform_indices = @transform_2, window_bounds = array<i64: 128, 1>}, {pipeline_mode = #tpu.pipeline_mode<synchronous>, transform_indices = @transform_3, window_bounds = array<i64: 128, 128>}, {pipeline_mode = #tpu.pipeline_mode<synchronous>, transform_indices = @transform_4, window_bounds = array<i64: 128, 1>}, {pipeline_mode = #tpu.pipeline_mode<synchronous>, transform_indices = @transform_5, window_bounds = array<i64: 128, 128>}, {pipeline_mode = #tpu.pipeline_mode<synchronous>, transform_indices = @transform_6, window_bounds = array<i64: 128, 1>}, {pipeline_mode = #tpu.pipeline_mode<synchronous>, transform_indices = @transform_7, window_bounds = array<i64: 8, 128>}, {pipeline_mode = #tpu.pipeline_mode<synchronous>, transform_indices = @transform_8, window_bounds = array<i64: 8, 1>}, {transform_indices = @transform_9, window_bounds = array<i64: 8, 16>}]} {
    %c0 = arith.constant 0 : index
    %c0_0 = arith.constant 0 : index
    %0 = vector.load %arg1[%c0, %c0_0] : memref<16x16xf32, #tpu.memory_space<vmem>>, vector<16x16xf32>
    %c0_1 = arith.constant 0 : index
    %c0_2 = arith.constant 0 : index
    %1 = vector.load %arg2[%c0_1, %c0_2] : memref<128x16xf32, #tpu.memory_space<vmem>>, vector<128x16xf32>
    %cst = arith.constant dense<0.000000e+00> : vector<128x16xf32>
    %2 = tpu.matmul %1, %0, %cst {dimension_numbers = #tpu.dot_dimension_numbers<[1], [0], [0], [1], [0, 0, 1, 1], [], []>} : vector<128x16xf32>, vector<16x16xf32>, vector<128x16xf32> -> vector<128x16xf32>
    %c0_3 = arith.constant 0 : index
    %c0_4 = arith.constant 0 : index
    %3 = vector.load %arg3[%c0_3, %c0_4] : memref<128x1xf32, #tpu.memory_space<vmem>>, vector<128x1xf32>
    %4 = vector.broadcast %3 : vector<128x1xf32> to vector<128x16xf32>
    %5 = arith.addf %2, %4 : vector<128x16xf32>
    %cst_5 = arith.constant 0.000000e+00 : f32
    %6 = vector.broadcast %cst_5 : f32 to vector<128x16xf32>
    %7 = arith.maximumf %5, %6 : vector<128x16xf32>
    %c0_6 = arith.constant 0 : index
    %c0_7 = arith.constant 0 : index
    %8 = vector.load %arg4[%c0_6, %c0_7] : memref<128x128xf32, #tpu.memory_space<vmem>>, vector<128x128xf32>
    %cst_8 = arith.constant dense<0.000000e+00> : vector<128x16xf32>
    %9 = tpu.matmul %8, %7, %cst_8 {dimension_numbers = #tpu.dot_dimension_numbers<[1], [0], [0], [1], [0, 0, 1, 1], [], []>} : vector<128x128xf32>, vector<128x16xf32>, vector<128x16xf32> -> vector<128x16xf32>
    %c0_9 = arith.constant 0 : index
    %c0_10 = arith.constant 0 : index
    %10 = vector.load %arg5[%c0_9, %c0_10] : memref<128x1xf32, #tpu.memory_space<vmem>>, vector<128x1xf32>
    %11 = vector.broadcast %10 : vector<128x1xf32> to vector<128x16xf32>
    %12 = arith.addf %9, %11 : vector<128x16xf32>
    %cst_11 = arith.constant 0.000000e+00 : f32
    %13 = vector.broadcast %cst_11 : f32 to vector<128x16xf32>
    %14 = arith.maximumf %12, %13 : vector<128x16xf32>
    %c0_12 = arith.constant 0 : index
    %c0_13 = arith.constant 0 : index
    %15 = vector.load %arg6[%c0_12, %c0_13] : memref<128x128xf32, #tpu.memory_space<vmem>>, vector<128x128xf32>
    %cst_14 = arith.constant dense<0.000000e+00> : vector<128x16xf32>
    %16 = tpu.matmul %15, %14, %cst_14 {dimension_numbers = #tpu.dot_dimension_numbers<[1], [0], [0], [1], [0, 0, 1, 1], [], []>} : vector<128x128xf32>, vector<128x16xf32>, vector<128x16xf32> -> vector<128x16xf32>
    %c0_15 = arith.constant 0 : index
    %c0_16 = arith.constant 0 : index
    %17 = vector.load %arg7[%c0_15, %c0_16] : memref<128x1xf32, #tpu.memory_space<vmem>>, vector<128x1xf32>
    %18 = vector.broadcast %17 : vector<128x1xf32> to vector<128x16xf32>
    %19 = arith.addf %16, %18 : vector<128x16xf32>
    %cst_17 = arith.constant 0.000000e+00 : f32
    %20 = vector.broadcast %cst_17 : f32 to vector<128x16xf32>
    %21 = arith.maximumf %19, %20 : vector<128x16xf32>
    %c0_18 = arith.constant 0 : index
    %c0_19 = arith.constant 0 : index
    %22 = vector.load %arg8[%c0_18, %c0_19] : memref<8x128xf32, #tpu.memory_space<vmem>>, vector<8x128xf32>
    %cst_20 = arith.constant dense<0.000000e+00> : vector<8x16xf32>
    %23 = tpu.matmul %22, %21, %cst_20 {dimension_numbers = #tpu.dot_dimension_numbers<[1], [0], [0], [1], [0, 0, 1, 1], [], []>} : vector<8x128xf32>, vector<128x16xf32>, vector<8x16xf32> -> vector<8x16xf32>
    %c0_21 = arith.constant 0 : index
    %c0_22 = arith.constant 0 : index
    %24 = vector.load %arg9[%c0_21, %c0_22] : memref<8x1xf32, #tpu.memory_space<vmem>>, vector<8x1xf32>
    %25 = vector.broadcast %24 : vector<8x1xf32> to vector<8x16xf32>
    %26 = arith.addf %23, %25 : vector<8x16xf32>
    %c0_23 = arith.constant 0 : index
    %c0_24 = arith.constant 0 : index
    %27 = vector.load %arg10[%c0_23, %c0_24] : memref<8x16xf32, #tpu.memory_space<vmem>>, vector<8x16xf32>
    tpu.vector_store %arg10[%c0_23, %c0_24], %26 {strides = array<i32>} : memref<8x16xf32, #tpu.memory_space<vmem>>, vector<8x16xf32>,
    return
  }
  func.func @transform_0(%arg0: i32) -> (i32, i32) {
    %c0_i32 = arith.constant 0 : i32
    %c0_i32_0 = arith.constant 0 : i32
    return %c0_i32, %arg0 : i32, i32
  }
  func.func @transform_1(%arg0: i32) -> (i32, i32) {
    %c0_i32 = arith.constant 0 : i32
    %c0_i32_0 = arith.constant 0 : i32
    %c0_i32_1 = arith.constant 0 : i32
    return %c0_i32, %c0_i32_0 : i32, i32
  }
  func.func @transform_2(%arg0: i32) -> (i32, i32) {
    %c0_i32 = arith.constant 0 : i32
    %c0_i32_0 = arith.constant 0 : i32
    %c0_i32_1 = arith.constant 0 : i32
    return %c0_i32, %c0_i32_0 : i32, i32
  }
  func.func @transform_3(%arg0: i32) -> (i32, i32) {
    %c0_i32 = arith.constant 0 : i32
    %c0_i32_0 = arith.constant 0 : i32
    %c0_i32_1 = arith.constant 0 : i32
    return %c0_i32, %c0_i32_0 : i32, i32
  }
  func.func @transform_4(%arg0: i32) -> (i32, i32) {
    %c0_i32 = arith.constant 0 : i32
    %c0_i32_0 = arith.constant 0 : i32
    %c0_i32_1 = arith.constant 0 : i32
    return %c0_i32, %c0_i32_0 : i32, i32
  }
  func.func @transform_5(%arg0: i32) -> (i32, i32) {
    %c0_i32 = arith.constant 0 : i32
    %c0_i32_0 = arith.constant 0 : i32
    %c0_i32_1 = arith.constant 0 : i32
    return %c0_i32, %c0_i32_0 : i32, i32
  }
  func.func @transform_6(%arg0: i32) -> (i32, i32) {
    %c0_i32 = arith.constant 0 : i32
    %c0_i32_0 = arith.constant 0 : i32
    %c0_i32_1 = arith.constant 0 : i32
    return %c0_i32, %c0_i32_0 : i32, i32
  }
  func.func @transform_7(%arg0: i32) -> (i32, i32) {
    %c0_i32 = arith.constant 0 : i32
    %c0_i32_0 = arith.constant 0 : i32
    %c0_i32_1 = arith.constant 0 : i32
    return %c0_i32, %c0_i32_0 : i32, i32
  }
  func.func @transform_8(%arg0: i32) -> (i32, i32) {
    %c0_i32 = arith.constant 0 : i32
    %c0_i32_0 = arith.constant 0 : i32
    %c0_i32_1 = arith.constant 0 : i32
    return %c0_i32, %c0_i32_0 : i32, i32
  }
  func.func @transform_9(%arg0: i32) -> (i32, i32) {
    %c0_i32 = arith.constant 0 : i32
    %c0_i32_0 = arith.constant 0 : i32
    return %c0_i32, %arg0 : i32, i32
  }
}

</mosaic_0001>

<bundles_post_ra>
// kernel: net_forward.1
= control target key start
LH: loop header
LB: loop body
LE: loop exit
PB: predicated region body
PF: predicated region fallthrough
CT: control target
= control target key end

     0   :  { %v746_v0 = vmov 0   ;;  %vm146_vm0 = vcmask 130048   ;;  %s1144_s2 = inlined_call_operand.vmem [shape: f32[128,1], index: 2, kind: input, shape index: {}]   ;;  %s1145_s0 = inlined_call_operand.vmem [shape: f32[16,16], index: 0, kind: input, shape index: {}]   ;;  %s1146_s1 = inlined_call_operand.vmem [shape: f32[128,16], index: 1, kind: input, shape index: {}]   ;;  %s1147_s4 = inlined_call_operand.vmem [shape: f32[128,1], index: 4, kind: input, shape index: {}]   ;;  %s1148_s6 = inlined_call_operand.vmem [shape: f32[128,1], index: 6, kind: input, shape index: {}]   ;;  %s1149_s8 = inlined_call_operand.vmem [shape: f32[8,1], index: 8, kind: input, shape index: {}]   ;;  %s1150_s3 = inlined_call_operand.vmem [shape: f32[128,128], index: 3, kind: input, shape index: {}]   ;;  %s1151_s5 = inlined_call_operand.vmem [shape: f32[128,128], index: 5, kind: input, shape index: {}]   ;;  %s1152_s7 = inlined_call_operand.vmem [shape: f32[8,128], index: 7, kind: input, shape index: {}]   ;;  %s1153_s9 = inlined_call_operand.vmem [shape: f32[8,16], index: 9, kind: output, shape index: {}]  }
   0x1   :  { %744 = vset.pattern.permute.xlu1 %v746_v0  ;;  %743 = vset.pattern.permute.xlu0 %v746_v0  ;;  %v65_v1 = vld [vmem:[%s1144_s2 + $0x78] sm:$0xff]  ;;  %v63_v2 = vld [vmem:[%s1144_s2 + $0x68] sm:$0xff]  ;;  %v32_v4 = vld [vmem:[%s1145_s0] sm:$0xff] }
   0x2   :  { %v33_v3 = vld [vmem:[%s1145_s0 + $0x8] sm:$0xff]  ;;  %143 = vperm.xlu0 %743, %v65_v1   ;;  %133 = vperm.xlu1 %744, %v63_v2   ;;  %v34_v5 = vld [vmem:[%s1146_s1] sm:$0xff]  ;;  %v61_v6 = vld [vmem:[%s1144_s2 + $0x58] sm:$0xff] }
   0x3   :  { %209 = vmatpush.msra.mxu0 %v33_v3  ;;  %745 = vset.pattern.permute.xlu2 %v746_v0  ;;  %v64_v7 = vld [vmem:[%s1144_s2 + $0x70] sm:$0xff]  ;;  %v62_v8 = vld [vmem:[%s1144_s2 + $0x60] sm:$0xff]  ;;  %v35_v10 = vld [vmem:[%s1146_s1 + $0x8] sm:$0xff] }
   0x4   :  { %123 = vperm.xlu2 %745, %v61_v6   ;;  %v60_v9 = vld [vmem:[%s1144_s2 + $0x50] sm:$0xff]  ;;  %v59_v11 = vld [vmem:[%s1144_s2 + $0x48] sm:$0xff]  ;;  %v58_v12 = vld [vmem:[%s1144_s2 + $0x40] sm:$0xff] }
   0x5   :  { %210 = vmatpush.msra.mxu0 %v32_v4  ;;  %v57_v13 = vld [vmem:[%s1144_s2 + $0x38] sm:$0xff]  ;;  %v36_v14 = vld [vmem:[%s1146_s1 + $0x10] sm:$0xff]  ;;  %v55_v16 = vld [vmem:[%s1144_s2 + $0x28] sm:$0xff] }
   0x6   :  { %694 = vmatmul.msk.f32.vlgmr.msra.gmra.mxu0 %vm146_vm0, %v34_v5  ;;  %v56_v15 = vld [vmem:[%s1144_s2 + $0x30] sm:$0xff]  ;;  %v54_v17 = vld [vmem:[%s1144_s2 + $0x20] sm:$0xff]  ;;  %v37_v18 = vld [vmem:[%s1146_s1 + $0x18] sm:$0xff] }
   0x7   :  { %v53_v19 = vld [vmem:[%s1144_s2 + $0x18] sm:$0xff]  ;;  %v52_v20 = vld [vmem:[%s1144_s2 + $0x10] sm:$0xff]  ;;  %v51_v21 = vld [vmem:[%s1144_s2 + $0x8] sm:$0xff] }
   0x8   :  { %v38_v22 = vld [vmem:[%s1146_s1 + $0x20] sm:$0xff]  ;;  %v307_v24 = vld [vmem:[%s1147_s4 + $0x78] sm:$0xff]  ;;  %v306_v25 = vld [vmem:[%s1147_s4 + $0x70] sm:$0xff] }
   0x9   :  { %v50_v23 = vld [vmem:[%s1144_s2] sm:$0xff]  ;;  %v39_v26 = vld [vmem:[%s1146_s1 + $0x28] sm:$0xff]  ;;  %v303_v29 = vld [vmem:[%s1147_s4 + $0x58] sm:$0xff] }
   0xa   :  { %138 = vperm.xlu0 %743, %v64_v7   ;;  %128 = vperm.xlu1 %744, %v62_v8   ;;  %v305_v27 = vld [vmem:[%s1147_s4 + $0x68] sm:$0xff]  ;;  %v304_v28 = vld [vmem:[%s1147_s4 + $0x60] sm:$0xff]  ;;  %v40_v30 = vld [vmem:[%s1146_s1 + $0x30] sm:$0xff] }
   0xb   :  { %v302_v31 = vld [vmem:[%s1147_s4 + $0x50] sm:$0xff]  ;;  %v301_v32 = vld [vmem:[%s1147_s4 + $0x48] sm:$0xff]  ;;  %v300_v33 = vld [vmem:[%s1147_s4 + $0x40] sm:$0xff] }
   0xc   :  { %118 = vperm.xlu2 %745, %v60_v9   ;;  %v41_v34 = vld [vmem:[%s1146_s1 + $0x38] sm:$0xff]  ;;  %v298_v36 = vld [vmem:[%s1147_s4 + $0x30] sm:$0xff]  ;;  %v297_v37 = vld [vmem:[%s1147_s4 + $0x28] sm:$0xff] }
   0xd   :  { %v299_v35 = vld [vmem:[%s1147_s4 + $0x38] sm:$0xff]  ;;  %v42_v38 = vld [vmem:[%s1146_s1 + $0x40] sm:$0xff]  ;;  %v294_v41 = vld [vmem:[%s1147_s4 + $0x10] sm:$0xff] }
   0xe   :  { %695 = vmatmul.msk.f32.gmra.mxu0 %vm146_vm0, %v35_v10  ;;  %v296_v39 = vld [vmem:[%s1147_s4 + $0x20] sm:$0xff]  ;;  %v295_v40 = vld [vmem:[%s1147_s4 + $0x18] sm:$0xff]  ;;  %v43_v42 = vld [vmem:[%s1146_s1 + $0x48] sm:$0xff] }
   0xf   :  { %v293_v43 = vld [vmem:[%s1147_s4 + $0x8] sm:$0xff]  ;;  %v292_v44 = vld [vmem:[%s1147_s4] sm:$0xff]  ;;  %v44_v45 = vld [vmem:[%s1146_s1 + $0x50] sm:$0xff] }
  0x10   :  { %v500_v46 = vld [vmem:[%s1148_s6 + $0x78] sm:$0xff]  ;;  %v499_v47 = vld [vmem:[%s1148_s6 + $0x70] sm:$0xff]  ;;  %v498_v48 = vld [vmem:[%s1148_s6 + $0x68] sm:$0xff] }
  0x11   :  { %v45_v49 = vld [vmem:[%s1146_s1 + $0x58] sm:$0xff]  ;;  %v497_v50 = vld [vmem:[%s1148_s6 + $0x60] sm:$0xff]  ;;  %v495_v52 = vld [vmem:[%s1148_s6 + $0x50] sm:$0xff] }
  0x12   :  { %113 = vperm.xlu0 %743, %v59_v11   ;;  %108 = vperm.xlu1 %744, %v58_v12   ;;  %v496_v51 = vld [vmem:[%s1148_s6 + $0x58] sm:$0xff]  ;;  %v46_v53 = vld [vmem:[%s1146_s1 + $0x60] sm:$0xff]  ;;  %v494_v54 = vld [vmem:[%s1148_s6 + $0x48] sm:$0xff] }
  0x13   :  { %v493_v55 = vld [vmem:[%s1148_s6 + $0x40] sm:$0xff]  ;;  %v492_v56 = vld [vmem:[%s1148_s6 + $0x38] sm:$0xff]  ;;  %v47_v57 = vld [vmem:[%s1146_s1 + $0x68] sm:$0xff] }
  0x14   :  { %103 = vperm.xlu2 %745, %v57_v13   ;;  %v491_v58 = vld [vmem:[%s1148_s6 + $0x30] sm:$0xff]  ;;  %v490_v59 = vld [vmem:[%s1148_s6 + $0x28] sm:$0xff]  ;;  %v489_v60 = vld [vmem:[%s1148_s6 + $0x20] sm:$0xff] }
  0x15   :  { %v48_v61 = vld [vmem:[%s1146_s1 + $0x70] sm:$0xff]  ;;  %v488_v62 = vld [vmem:[%s1148_s6 + $0x18] sm:$0xff]  ;;  %v486_v0 = vld [vmem:[%s1148_s6 + $0x8] sm:$0xff] }
  0x16   :  { %696 = vmatmul.msk.f32.gmra.mxu0 %vm146_vm0, %v36_v14  ;;  %v487_v63 = vld [vmem:[%s1148_s6 + $0x10] sm:$0xff]  ;;  %v49_v1 = vld [vmem:[%s1146_s1 + $0x78] sm:$0xff]  ;;  %v485_v2 = vld [vmem:[%s1148_s6] sm:$0xff] }
  0x17   :  { %v663_v3 = vld [vmem:[%s1149_s8] sm:$0xff] }
  0x1a   :  { %98 = vperm.xlu0 %743, %v56_v15   ;;  %93 = vperm.xlu1 %744, %v55_v16  }
  0x1c   :  { %88 = vperm.xlu2 %745, %v54_v17  }
  0x1e   :  { %697 = vmatmul.msk.f32.gmra.mxu0 %vm146_vm0, %v37_v18 }
  0x22   :  { %83 = vperm.xlu0 %743, %v53_v19   ;;  %78 = vperm.xlu1 %744, %v52_v20  }
  0x24   :  { %73 = vperm.xlu2 %745, %v51_v21  }
  0x26   :  { %698 = vmatmul.msk.f32.gmra.mxu0 %vm146_vm0, %v38_v22 }
  0x2a   :  { %68 = vperm.xlu0 %743, %v50_v23   ;;  %385 = vperm.xlu1 %744, %v307_v24  }
  0x2c   :  { %380 = vperm.xlu2 %745, %v306_v25  }
  0x2e   :  { %699 = vmatmul.msk.f32.gmra.mxu0 %vm146_vm0, %v39_v26 }
  0x32   :  { %375 = vperm.xlu0 %743, %v305_v27   ;;  %370 = vperm.xlu1 %744, %v304_v28  }
  0x34   :  { %365 = vperm.xlu2 %745, %v303_v29  }
  0x36   :  { %700 = vmatmul.msk.f32.gmra.mxu0 %vm146_vm0, %v40_v30 }
  0x3a   :  { %360 = vperm.xlu0 %743, %v302_v31   ;;  %355 = vperm.xlu1 %744, %v301_v32  }
  0x3c   :  { %350 = vperm.xlu2 %745, %v300_v33  }
  0x3e   :  { %701 = vmatmul.msk.f32.gmra.mxu0 %vm146_vm0, %v41_v34 }
  0x42   :  { %345 = vperm.xlu0 %743, %v299_v35   ;;  %340 = vperm.xlu1 %744, %v298_v36  }
  0x44   :  { %335 = vperm.xlu2 %745, %v297_v37  }
  0x46   :  { %702 = vmatmul.msk.f32.gmra.mxu0 %vm146_vm0, %v42_v38 }
  0x4a   :  { %330 = vperm.xlu0 %743, %v296_v39   ;;  %325 = vperm.xlu1 %744, %v295_v40  }
  0x4c   :  { %320 = vperm.xlu2 %745, %v294_v41  }
  0x4e   :  { %703 = vmatmul.msk.f32.gmra.mxu0 %vm146_vm0, %v43_v42 }
  0x52   :  { %315 = vperm.xlu0 %743, %v293_v43   ;;  %310 = vperm.xlu1 %744, %v292_v44  }
  0x54   :  { %578 = vperm.xlu2 %745, %v500_v46  }
  0x56   :  { %704 = vmatmul.msk.f32.gmra.mxu0 %vm146_vm0, %v44_v45 }
  0x5a   :  { %573 = vperm.xlu0 %743, %v499_v47   ;;  %568 = vperm.xlu1 %744, %v498_v48  }
  0x5c   :  { %563 = vperm.xlu2 %745, %v497_v50  }
  0x5e   :  { %705 = vmatmul.msk.f32.gmra.mxu0 %vm146_vm0, %v45_v49  ;;  %v124_v19 = vpop.permute.xlu2 %123 }
  0x62   :  { %558 = vperm.xlu0 %743, %v496_v51   ;;  %553 = vperm.xlu1 %744, %v495_v52  }
  0x64   :  { %548 = vperm.xlu2 %745, %v494_v54  }
  0x66   :  { %706 = vmatmul.msk.f32.gmra.mxu0 %vm146_vm0, %v46_v53  ;;  %v119_v24 = vpop.permute.xlu2 %118 }
  0x6a   :  { %543 = vperm.xlu0 %743, %v493_v55   ;;  %538 = vperm.xlu1 %744, %v492_v56  }
  0x6c   :  { %533 = vperm.xlu2 %745, %v491_v58  }
  0x6e   :  { %707 = vmatmul.msk.f32.gmra.mxu0 %vm146_vm0, %v47_v57  ;;  %v104_v32 = vpop.permute.xlu2 %103 }
  0x72   :  { %528 = vperm.xlu0 %743, %v490_v59   ;;  %523 = vperm.xlu1 %744, %v489_v60  }
  0x74   :  { %518 = vperm.xlu2 %745, %v488_v62   ;;  %v144_v16 = vpop.permute.xlu0 %143  ;;  %v134_v18 = vpop.permute.xlu1 %133 }
  0x76   :  { %708 = vmatmul.msk.f32.gmra.mxu0 %vm146_vm0, %v48_v61  ;;  %v89_v45 = vpop.permute.xlu2 %88 }
  0x7a   :  { %513 = vperm.xlu0 %743, %v487_v63   ;;  %508 = vperm.xlu1 %744, %v486_v0  }
  0x7c   :  { %503 = vperm.xlu2 %745, %v485_v2   ;;  %v139_v21 = vpop.permute.xlu0 %138  ;;  %v129_v22 = vpop.permute.xlu1 %128 }
  0x7e   :  { %709 = vmatmul.msk.f32.gmra.mxu0 %vm146_vm0, %v49_v1  ;;  %v74_v58 = vpop.permute.xlu2 %73 }
  0x82   :  { %666 = vperm.xlu0 %743, %v663_v3  }
  0x83   :  { %v1014_v4 = vpop.f32.mrf.mxu0 }
  0x84   :  { %v114_v25 = vpop.permute.xlu0 %113  ;;  %v109_v29 = vpop.permute.xlu1 %108 }
  0x8b   :  { %v1016_v5 = vpop.f32.mrf.mxu0 }
  0x8c   :  { %v99_v35 = vpop.permute.xlu0 %98  ;;  %v94_v42 = vpop.permute.xlu1 %93  ;;  %v216_v62 = vadd.f32 %v1016_v5, %v74_v58  ;;  %v288_v5 = vld [vmem:[%s1150_s3 + $0x60] sm:$0xff] }
  0x8e   :  { %v261_v2 = vmax.f32 %v216_v62, 0.0 }
  0x93   :  { %v1018_v6 = vpop.f32.mrf.mxu0 }
  0x94   :  { %v84_v48 = vpop.permute.xlu0 %83  ;;  %v79_v55 = vpop.permute.xlu1 %78 }
  0x95   :  { %v219_v59 = vadd.f32 %v1018_v6, %v79_v55  ;;  %v276_v6 = vld [vmem:[%s1150_s3] sm:$0xff] }
  0x97   :  { %v262_v0 = vmax.f32 %v219_v59, 0.0 }
  0x9b   :  { %v1020_v7 = vpop.f32.mrf.mxu0 }
  0x9c   :  { %v222_v56 = vadd.f32 %v1020_v7, %v84_v48  ;;  %v69_v61 = vpop.permute.xlu0 %68  ;;  %v289_v7 = vld [vmem:[%s1150_s3 + $0x68] sm:$0xff] }
  0x9d   :  { %v213_v1 = vadd.f32 %v1014_v4, %v69_v61  ;;  %v277_v4 = vld [vmem:[%s1150_s3 + $0x8] sm:$0xff] }
  0x9e   :  { %v263_v63 = vmax.f32 %v222_v56, 0.0 }
  0x9f   :  { %v260_v3 = vmax.f32 %v213_v1, 0.0 }
  0xa3   :  { %v224_v8 = vpop.f32.mrf.mxu0 }
  0xa4   :  { %v225_v53 = vadd.f32 %v224_v8, %v89_v45  ;;  %v278_v8 = vld [vmem:[%s1150_s3 + $0x10] sm:$0xff] }
  0xa6   :  { %v264_v60 = vmax.f32 %v225_v53, 0.0 }
  0xab   :  { %v227_v9 = vpop.f32.mrf.mxu0 }
  0xac   :  { %v228_v51 = vadd.f32 %v227_v9, %v94_v42  ;;  %v290_v9 = vld [vmem:[%s1150_s3 + $0x70] sm:$0xff] }
  0xae   :  { %v265_v57 = vmax.f32 %v228_v51, 0.0 }
  0xb3   :  { %v230_v10 = vpop.f32.mrf.mxu0 }
  0xb4   :  { %v231_v49 = vadd.f32 %v230_v10, %v99_v35  ;;  %v279_v10 = vld [vmem:[%s1150_s3 + $0x18] sm:$0xff] }
  0xb6   :  { %v266_v54 = vmax.f32 %v231_v49, 0.0 }
  0xbb   :  { %v233_v11 = vpop.f32.mrf.mxu0 }
  0xbc   :  { %v234_v46 = vadd.f32 %v233_v11, %v104_v32  ;;  %v291_v11 = vld [vmem:[%s1150_s3 + $0x78] sm:$0xff]  ;;  %v376_v32 = vpop.permute.xlu0 %375 }
  0xbe   :  { %v267_v52 = vmax.f32 %v234_v46, 0.0 }
  0xc3   :  { %v236_v12 = vpop.f32.mrf.mxu0 }
  0xc4   :  { %v237_v43 = vadd.f32 %v236_v12, %v109_v29  ;;  %v280_v12 = vld [vmem:[%s1150_s3 + $0x20] sm:$0xff] }
  0xc6   :  { %v268_v50 = vmax.f32 %v237_v43, 0.0 }
  0xcb   :  { %v239_v13 = vpop.f32.mrf.mxu0 }
  0xcc   :  { %v240_v40 = vadd.f32 %v239_v13, %v114_v25  ;;  %v281_v13 = vld [vmem:[%s1150_s3 + $0x28] sm:$0xff] }
  0xce   :  { %v269_v47 = vmax.f32 %v240_v40, 0.0 }
  0xd3   :  { %v242_v14 = vpop.f32.mrf.mxu0 }
  0xd4   :  { %v243_v38 = vadd.f32 %v242_v14, %v119_v24  ;;  %v282_v14 = vld [vmem:[%s1150_s3 + $0x30] sm:$0xff] }
  0xd6   :  { %v270_v44 = vmax.f32 %v243_v38, 0.0 }
  0xdb   :  { %v245_v15 = vpop.f32.mrf.mxu0 }
  0xdc   :  { %v246_v36 = vadd.f32 %v245_v15, %v124_v19  ;;  %v283_v15 = vld [vmem:[%s1150_s3 + $0x38] sm:$0xff] }
  0xdd   :  { %v287_v19 = vld [vmem:[%s1150_s3 + $0x58] sm:$0xff] }
  0xde   :  { %v271_v41 = vmax.f32 %v246_v36, 0.0 }
  0xe3   :  { %v248_v17 = vpop.f32.mrf.mxu0 }
  0xe4   :  { %v249_v33 = vadd.f32 %v248_v17, %v129_v22  ;;  %v285_v17 = vld [vmem:[%s1150_s3 + $0x48] sm:$0xff] }
  0xe6   :  { %v272_v39 = vmax.f32 %v249_v33, 0.0 }
  0xeb   :  { %v251_v20 = vpop.f32.mrf.mxu0 }
  0xec   :  { %v252_v30 = vadd.f32 %v251_v20, %v134_v18  ;;  %v286_v18 = vld [vmem:[%s1150_s3 + $0x50] sm:$0xff] }
  0xee   :  { %v273_v37 = vmax.f32 %v252_v30, 0.0 }
  0xf3   :  { %v254_v23 = vpop.f32.mrf.mxu0 }
  0xf4   :  { %v255_v27 = vadd.f32 %v254_v23, %v139_v21 }
  0xf6   :  { %v274_v34 = vmax.f32 %v255_v27, 0.0 }
  0xfb   :  { %v257_v26 = vpop.f32.mrf.mxu0 }
  0xfc   :  { %v258_v28 = vadd.f32 %v257_v26, %v144_v16  ;;  %v284_v16 = vld [vmem:[%s1150_s3 + $0x40] sm:$0xff]  ;;  %v386_v26 = vpop.permute.xlu1 %385 }
  0xfe   :  { %v275_v31 = vmax.f32 %v258_v28, 0.0  ;;  %v381_v28 = vpop.permute.xlu2 %380 }
 0x100   :  { %388 = vmatpush.msra.mxu1 %v275_v31  ;;  %710 = vmatpush.msra.mxu3 %v275_v31 }
 0x102   :  { %389 = vmatpush.msra.mxu1 %v274_v34  ;;  %711 = vmatpush.msra.mxu3 %v274_v34 }
 0x104   :  { %390 = vmatpush.msra.mxu1 %v273_v37  ;;  %712 = vmatpush.msra.mxu3 %v273_v37  ;;  %v371_v36 = vpop.permute.xlu1 %370 }
 0x106   :  { %391 = vmatpush.msra.mxu1 %v272_v39  ;;  %713 = vmatpush.msra.mxu3 %v272_v39  ;;  %v366_v46 = vpop.permute.xlu2 %365 }
 0x108   :  { %392 = vmatpush.msra.mxu1 %v271_v41  ;;  %714 = vmatpush.msra.mxu3 %v271_v41 }
 0x10a   :  { %393 = vmatpush.msra.mxu1 %v270_v44  ;;  %715 = vmatpush.msra.mxu3 %v270_v44 }
 0x10c   :  { %394 = vmatpush.msra.mxu1 %v269_v47  ;;  %716 = vmatpush.msra.mxu3 %v269_v47  ;;  %v361_v47 = vpop.permute.xlu0 %360  ;;  %v356_v48 = vpop.permute.xlu1 %355 }
 0x10e   :  { %395 = vmatpush.msra.mxu1 %v268_v50  ;;  %717 = vmatpush.msra.mxu3 %v268_v50  ;;  %v351_v50 = vpop.permute.xlu2 %350 }
 0x110   :  { %396 = vmatpush.msra.mxu1 %v267_v52  ;;  %718 = vmatpush.msra.mxu3 %v267_v52 }
 0x112   :  { %397 = vmatpush.msra.mxu1 %v266_v54  ;;  %719 = vmatpush.msra.mxu3 %v266_v54 }
 0x114   :  { %398 = vmatpush.msra.mxu1 %v265_v57  ;;  %720 = vmatpush.msra.mxu3 %v265_v57  ;;  %v346_v51 = vpop.permute.xlu0 %345  ;;  %v341_v52 = vpop.permute.xlu1 %340 }
 0x116   :  { %399 = vmatpush.msra.mxu1 %v264_v60  ;;  %721 = vmatpush.msra.mxu3 %v264_v60  ;;  %v336_v60 = vpop.permute.xlu2 %335 }
 0x118   :  { %400 = vmatpush.msra.mxu1 %v263_v63  ;;  %722 = vmatpush.msra.mxu3 %v263_v63 }
 0x11a   :  { %401 = vmatpush.msra.mxu1 %v262_v0  ;;  %723 = vmatpush.msra.mxu3 %v262_v0 }
 0x11c   :  { %402 = vmatpush.msra.mxu1 %v261_v2  ;;  %724 = vmatpush.msra.mxu3 %v261_v2  ;;  %v331_v63 = vpop.permute.xlu0 %330  ;;  %v326_v2 = vpop.permute.xlu1 %325 }
 0x11e   :  { %403 = vmatpush.msra.mxu1 %v260_v3  ;;  %725 = vmatpush.msra.mxu3 %v260_v3 }
 0x11f   :  { %404 = vmatmul.f32.vlgmr.msra.gmra.mxu1 %v276_v6  ;;  %440 = vmatmul.f32.vlgmr.msra.gmra.mxu3 %v288_v5 }
 0x127   :  { %407 = vmatmul.f32.gmra.mxu1 %v277_v4  ;;  %443 = vmatmul.f32.gmra.mxu3 %v289_v7 }
 0x12f   :  { %410 = vmatmul.f32.gmra.mxu1 %v278_v8  ;;  %446 = vmatmul.f32.gmra.mxu3 %v290_v9  ;;  %v321_v9 = vpop.permute.xlu2 %320 }
 0x137   :  { %413 = vmatmul.f32.gmra.mxu1 %v279_v10  ;;  %449 = vmatmul.f32.gmra.mxu3 %v291_v11 }
 0x13f   :  { %416 = vmatmul.f32.gmra.mxu1 %v280_v12  ;;  %v316_v12 = vpop.permute.xlu0 %315 }
 0x147   :  { %419 = vmatmul.f32.gmra.mxu1 %v281_v13 }
 0x14f   :  { %422 = vmatmul.f32.gmra.mxu1 %v282_v14 }
 0x157   :  { %425 = vmatmul.f32.gmra.mxu1 %v283_v15  ;;  %v311_v15 = vpop.permute.xlu1 %310 }
 0x15f   :  { %428 = vmatmul.f32.gmra.mxu1 %v284_v16 }
 0x167   :  { %431 = vmatmul.f32.gmra.mxu1 %v285_v17 }
 0x16f   :  { %434 = vmatmul.f32.gmra.mxu1 %v286_v18 }
 0x177   :  { %437 = vmatmul.f32.gmra.mxu1 %v287_v19 }
 0x19c   :  { %v1074_v20 = vpop.f32.mrf.mxu1 }
 0x19d   :  { %v406_v16 = vadd.f32 %v1074_v20, %v311_v15  ;;  %v470_v20 = vld [vmem:[%s1151_s5 + $0x8] sm:$0xff] }
 0x19f   :  { %v453_v19 = vmax.f32 %v406_v16, 0.0 }
 0x1a2   :  { %v441_v21 = vpop.f32.mrf.mxu3 }
 0x1a3   :  { %v442_v37 = vadd.f32 %v441_v21, %v371_v36  ;;  %v469_v21 = vld [vmem:[%s1151_s5] sm:$0xff] }
 0x1a4   :  { %v1076_v22 = vpop.f32.mrf.mxu1 }
 0x1a5   :  { %v465_v40 = vmax.f32 %v442_v37, 0.0  ;;  %v409_v13 = vadd.f32 %v1076_v22, %v316_v12  ;;  %v481_v22 = vld [vmem:[%s1151_s5 + $0x60] sm:$0xff] }
 0x1a7   :  { %v454_v18 = vmax.f32 %v409_v13, 0.0 }
 0x1aa   :  { %v444_v23 = vpop.f32.mrf.mxu3 }
 0x1ab   :  { %v445_v34 = vadd.f32 %v444_v23, %v376_v32  ;;  %v482_v23 = vld [vmem:[%s1151_s5 + $0x68] sm:$0xff]  ;;  %v477_v32 = vld [vmem:[%s1151_s5 + $0x40] sm:$0xff] }
 0x1ac   :  { %v1078_v24 = vpop.f32.mrf.mxu1 }
 0x1ad   :  { %v466_v39 = vmax.f32 %v445_v34, 0.0  ;;  %v412_v10 = vadd.f32 %v1078_v24, %v321_v9  ;;  %v471_v24 = vld [vmem:[%s1151_s5 + $0x10] sm:$0xff] }
 0x1ae   :  { %v479_v34 = vld [vmem:[%s1151_s5 + $0x50] sm:$0xff] }
 0x1af   :  { %v455_v17 = vmax.f32 %v412_v10, 0.0 }
 0x1b2   :  { %v447_v25 = vpop.f32.mrf.mxu3 }
 0x1b3   :  { %v448_v30 = vadd.f32 %v447_v25, %v381_v28  ;;  %v483_v25 = vld [vmem:[%s1151_s5 + $0x70] sm:$0xff]  ;;  %v473_v28 = vld [vmem:[%s1151_s5 + $0x20] sm:$0xff] }
 0x1b4   :  { %v414_v27 = vpop.f32.mrf.mxu1 }
 0x1b5   :  { %v467_v38 = vmax.f32 %v448_v30, 0.0  ;;  %v415_v7 = vadd.f32 %v414_v27, %v326_v2  ;;  %v484_v27 = vld [vmem:[%s1151_s5 + $0x78] sm:$0xff]  ;;  %v475_v30 = vld [vmem:[%s1151_s5 + $0x30] sm:$0xff] }
 0x1b7   :  { %v456_v14 = vmax.f32 %v415_v7, 0.0 }
 0x1ba   :  { %v450_v29 = vpop.f32.mrf.mxu3 }
 0x1bb   :  { %v451_v31 = vadd.f32 %v450_v29, %v386_v26  ;;  %v472_v26 = vld [vmem:[%s1151_s5 + $0x18] sm:$0xff]  ;;  %v474_v29 = vld [vmem:[%s1151_s5 + $0x28] sm:$0xff] }
 0x1bc   :  { %v417_v33 = vpop.f32.mrf.mxu1 }
 0x1bd   :  { %v468_v35 = vmax.f32 %v451_v31, 0.0  ;;  %v418_v5 = vadd.f32 %v417_v33, %v331_v63  ;;  %v476_v31 = vld [vmem:[%s1151_s5 + $0x38] sm:$0xff]  ;;  %v478_v33 = vld [vmem:[%s1151_s5 + $0x48] sm:$0xff] }
 0x1bf   :  { %581 = vmatpush.msra.mxu2 %v468_v35  ;;  %726 = vmatpush.msrb.mxu3 %v468_v35  ;;  %v457_v11 = vmax.f32 %v418_v5, 0.0  ;;  %v480_v35 = vld [vmem:[%s1151_s5 + $0x58] sm:$0xff] }
 0x1c1   :  { %582 = vmatpush.msra.mxu2 %v467_v38  ;;  %727 = vmatpush.msrb.mxu3 %v467_v38 }
 0x1c3   :  { %583 = vmatpush.msra.mxu2 %v466_v39  ;;  %728 = vmatpush.msrb.mxu3 %v466_v39 }
 0x1c4   :  { %v420_v41 = vpop.f32.mrf.mxu1 }
 0x1c5   :  { %584 = vmatpush.msra.mxu2 %v465_v40  ;;  %729 = vmatpush.msrb.mxu3 %v465_v40  ;;  %v421_v3 = vadd.f32 %v420_v41, %v336_v60 }
 0x1c7   :  { %v458_v8 = vmax.f32 %v421_v3, 0.0 }
 0x1cc   :  { %v423_v42 = vpop.f32.mrf.mxu1 }
 0x1cd   :  { %v424_v0 = vadd.f32 %v423_v42, %v341_v52  ;;  %v579_v42 = vpop.permute.xlu2 %578 }
 0x1cf   :  { %v459_v4 = vmax.f32 %v424_v0, 0.0 }
 0x1d4   :  { %v426_v43 = vpop.f32.mrf.mxu1 }
 0x1d5   :  { %v427_v61 = vadd.f32 %v426_v43, %v346_v51  ;;  %v574_v43 = vpop.permute.xlu0 %573  ;;  %v564_v51 = vpop.permute.xlu2 %563 }
 0x1d7   :  { %v460_v6 = vmax.f32 %v427_v61, 0.0 }
 0x1dc   :  { %v429_v44 = vpop.f32.mrf.mxu1 }
 0x1dd   :  { %v430_v58 = vadd.f32 %v429_v44, %v351_v50  ;;  %v549_v0 = vpop.permute.xlu2 %548 }
 0x1df   :  { %v461_v1 = vmax.f32 %v430_v58, 0.0 }
 0x1e4   :  { %v432_v45 = vpop.f32.mrf.mxu1 }
 0x1e5   :  { %v433_v56 = vadd.f32 %v432_v45, %v356_v48  ;;  %v569_v48 = vpop.permute.xlu1 %568 }
 0x1e7   :  { %v462_v62 = vmax.f32 %v433_v56, 0.0 }
 0x1ec   :  { %v435_v49 = vpop.f32.mrf.mxu1 }
 0x1ed   :  { %v436_v54 = vadd.f32 %v435_v49, %v361_v47  ;;  %v554_v63 = vpop.permute.xlu1 %553 }
 0x1ef   :  { %v463_v59 = vmax.f32 %v436_v54, 0.0 }
 0x1f4   :  { %v438_v53 = vpop.f32.mrf.mxu1 }
 0x1f5   :  { %v439_v55 = vadd.f32 %v438_v53, %v366_v46  ;;  %v539_v3 = vpop.permute.xlu1 %538 }
 0x1f7   :  { %v464_v57 = vmax.f32 %v439_v55, 0.0 }
 0x1f9   :  { %585 = vmatpush.msra.mxu2 %v464_v57  ;;  %730 = vmatpush.msrb.mxu3 %v464_v57 }
 0x1fb   :  { %586 = vmatpush.msra.mxu2 %v463_v59  ;;  %731 = vmatpush.msrb.mxu3 %v463_v59 }
 0x1fd   :  { %587 = vmatpush.msra.mxu2 %v462_v62  ;;  %732 = vmatpush.msrb.mxu3 %v462_v62  ;;  %v559_v62 = vpop.permute.xlu0 %558  ;;  %v524_v15 = vpop.permute.xlu1 %523 }
 0x1ff   :  { %588 = vmatpush.msra.mxu2 %v461_v1  ;;  %733 = vmatpush.msrb.mxu3 %v461_v1 }
 0x201   :  { %589 = vmatpush.msra.mxu2 %v460_v6  ;;  %734 = vmatpush.msrb.mxu3 %v460_v6  ;;  %v534_v6 = vpop.permute.xlu2 %533 }
 0x203   :  { %590 = vmatpush.msra.mxu2 %v459_v4  ;;  %735 = vmatpush.msrb.mxu3 %v459_v4 }
 0x205   :  { %591 = vmatpush.msra.mxu2 %v458_v8  ;;  %736 = vmatpush.msrb.mxu3 %v458_v8  ;;  %v544_v2 = vpop.permute.xlu0 %543 }
 0x207   :  { %592 = vmatpush.msra.mxu2 %v457_v11  ;;  %737 = vmatpush.msrb.mxu3 %v457_v11 }
 0x209   :  { %593 = vmatpush.msra.mxu2 %v456_v14  ;;  %738 = vmatpush.msrb.mxu3 %v456_v14 }
 0x20b   :  { %594 = vmatpush.msra.mxu2 %v455_v17  ;;  %739 = vmatpush.msrb.mxu3 %v455_v17 }
 0x20d   :  { %595 = vmatpush.msra.mxu2 %v454_v18  ;;  %740 = vmatpush.msrb.mxu3 %v454_v18  ;;  %v529_v12 = vpop.permute.xlu0 %528  ;;  %v519_v18 = vpop.permute.xlu2 %518 }
 0x20f   :  { %596 = vmatpush.msra.mxu2 %v453_v19  ;;  %741 = vmatpush.msrb.mxu3 %v453_v19 }
 0x210   :  { %597 = vmatmul.f32.vlgmr.msra.gmra.mxu2 %v469_v21  ;;  %633 = vmatmul.f32.vlgmr.msrb.gmra.mxu3 %v481_v22 }
 0x218   :  { %600 = vmatmul.f32.gmra.mxu2 %v470_v20  ;;  %636 = vmatmul.f32.gmra.mxu3 %v482_v23 }
 0x220   :  { %603 = vmatmul.f32.gmra.mxu2 %v471_v24  ;;  %639 = vmatmul.f32.gmra.mxu3 %v483_v25  ;;  %v514_v25 = vpop.permute.xlu0 %513 }
 0x228   :  { %606 = vmatmul.f32.gmra.mxu2 %v472_v26  ;;  %642 = vmatmul.f32.gmra.mxu3 %v484_v27 }
 0x230   :  { %609 = vmatmul.f32.gmra.mxu2 %v473_v28  ;;  %v509_v28 = vpop.permute.xlu1 %508 }
 0x238   :  { %612 = vmatmul.f32.gmra.mxu2 %v474_v29 }
 0x240   :  { %615 = vmatmul.f32.gmra.mxu2 %v475_v30 }
 0x248   :  { %618 = vmatmul.f32.gmra.mxu2 %v476_v31  ;;  %v504_v31 = vpop.permute.xlu2 %503 }
 0x250   :  { %621 = vmatmul.f32.gmra.mxu2 %v477_v32 }
 0x258   :  { %624 = vmatmul.f32.gmra.mxu2 %v478_v33 }
 0x260   :  { %627 = vmatmul.f32.gmra.mxu2 %v479_v34 }
 0x268   :  { %630 = vmatmul.f32.gmra.mxu2 %v480_v35 }
 0x293   :  { %v1131_v36 = vpop.f32.mrf.mxu2  ;;  %v634_v37 = vpop.f32.mrf.mxu3 }
 0x294   :  { %v635_v52 = vadd.f32 %v634_v37, %v564_v51  ;;  %v599_v32 = vadd.f32 %v1131_v36, %v504_v31  ;;  %v662_v37 = vld [vmem:[%s1152_s7] sm:$0xff] }
 0x296   :  { %v658_v56 = vmax.f32 %v635_v52, 0.0  ;;  %v646_v35 = vmax.f32 %v599_v32, 0.0 }
 0x29b   :  { %v1133_v38 = vpop.f32.mrf.mxu2  ;;  %v637_v39 = vpop.f32.mrf.mxu3 }
 0x29c   :  { %v638_v49 = vadd.f32 %v637_v39, %v569_v48  ;;  %v602_v29 = vadd.f32 %v1133_v38, %v509_v28  ;;  %v667_v39 = vpop.permute.xlu0 %666 }
 0x29e   :  { %v659_v54 = vmax.f32 %v638_v49, 0.0  ;;  %v647_v34 = vmax.f32 %v602_v29, 0.0 }
 0x2a3   :  { %v604_v40 = vpop.f32.mrf.mxu2  ;;  %v640_v41 = vpop.f32.mrf.mxu3 }
 0x2a4   :  { %v641_v46 = vadd.f32 %v640_v41, %v574_v43  ;;  %v605_v26 = vadd.f32 %v604_v40, %v514_v25 }
 0x2a6   :  { %v660_v53 = vmax.f32 %v641_v46, 0.0  ;;  %v648_v33 = vmax.f32 %v605_v26, 0.0 }
 0x2ab   :  { %v607_v44 = vpop.f32.mrf.mxu2  ;;  %v643_v45 = vpop.f32.mrf.mxu3 }
 0x2ac   :  { %v644_v47 = vadd.f32 %v643_v45, %v579_v42  ;;  %v608_v23 = vadd.f32 %v607_v44, %v519_v18 }
 0x2ae   :  { %v661_v50 = vmax.f32 %v644_v47, 0.0  ;;  %v649_v30 = vmax.f32 %v608_v23, 0.0 }
 0x2b0   :  { %669 = vmatpush.msra.mxu3 %v661_v50 }
 0x2b2   :  { %670 = vmatpush.msra.mxu3 %v660_v53 }
 0x2b3   :  { %v610_v55 = vpop.f32.mrf.mxu2 }
 0x2b4   :  { %671 = vmatpush.msra.mxu3 %v659_v54  ;;  %v611_v22 = vadd.f32 %v610_v55, %v524_v15 }
 0x2b6   :  { %672 = vmatpush.msra.mxu3 %v658_v56  ;;  %v650_v27 = vmax.f32 %v611_v22, 0.0 }
 0x2bb   :  { %v613_v57 = vpop.f32.mrf.mxu2 }
 0x2bc   :  { %v614_v19 = vadd.f32 %v613_v57, %v529_v12 }
 0x2be   :  { %v651_v24 = vmax.f32 %v614_v19, 0.0 }
 0x2c3   :  { %v616_v58 = vpop.f32.mrf.mxu2 }
 0x2c4   :  { %v617_v16 = vadd.f32 %v616_v58, %v534_v6 }
 0x2c6   :  { %v652_v20 = vmax.f32 %v617_v16, 0.0 }
 0x2cb   :  { %v619_v59 = vpop.f32.mrf.mxu2 }
 0x2cc   :  { %v620_v13 = vadd.f32 %v619_v59, %v539_v3 }
 0x2ce   :  { %v653_v21 = vmax.f32 %v620_v13, 0.0 }
 0x2d3   :  { %v622_v60 = vpop.f32.mrf.mxu2 }
 0x2d4   :  { %v623_v10 = vadd.f32 %v622_v60, %v544_v2 }
 0x2d6   :  { %v654_v17 = vmax.f32 %v623_v10, 0.0 }
 0x2db   :  { %v625_v61 = vpop.f32.mrf.mxu2 }
 0x2dc   :  { %v626_v8 = vadd.f32 %v625_v61, %v549_v0 }
 0x2de   :  { %v655_v14 = vmax.f32 %v626_v8, 0.0 }
 0x2e3   :  { %v628_v1 = vpop.f32.mrf.mxu2 }
 0x2e4   :  { %v629_v4 = vadd.f32 %v628_v1, %v554_v63 }
 0x2e6   :  { %v656_v11 = vmax.f32 %v629_v4, 0.0 }
 0x2eb   :  { %v631_v5 = vpop.f32.mrf.mxu2 }
 0x2ec   :  { %v632_v7 = vadd.f32 %v631_v5, %v559_v62 }
 0x2ee   :  { %v657_v9 = vmax.f32 %v632_v7, 0.0 }
 0x2f0   :  { %673 = vmatpush.msra.mxu3 %v657_v9 }
 0x2f2   :  { %674 = vmatpush.msra.mxu3 %v656_v11 }
 0x2f4   :  { %675 = vmatpush.msra.mxu3 %v655_v14 }
 0x2f6   :  { %676 = vmatpush.msra.mxu3 %v654_v17 }
 0x2f8   :  { %677 = vmatpush.msra.mxu3 %v653_v21 }
 0x2fa   :  { %678 = vmatpush.msra.mxu3 %v652_v20 }
 0x2fc   :  { %679 = vmatpush.msra.mxu3 %v651_v24 }
 0x2fe   :  { %680 = vmatpush.msra.mxu3 %v650_v27 }
 0x300   :  { %681 = vmatpush.msra.mxu3 %v649_v30 }
 0x302   :  { %682 = vmatpush.msra.mxu3 %v648_v33 }
 0x304   :  { %683 = vmatpush.msra.mxu3 %v647_v34 }
 0x306   :  { %684 = vmatpush.msra.mxu3 %v646_v35 }
 0x307   :  { %685 = vmatmul.f32.vlgmr.msra.gmra.mxu3 %v662_v37 }
 0x38a   :  { %v686_v40 = vpop.f32.mrf.mxu3 }
 0x38b   :  { %v687_v38 = vadd.f32 %v686_v40, %v667_v39 }
 0x38d   :  { %689 = vst.msk [vmem:[%s1153_s9] sm:$0xff] %vm146_vm0, %v687_v38 }

</bundles_post_ra>
